<compile_context>
chip_gen: v7x
topology: tpu7x:2x2x1
jax: 0.10.0
libtpu: 0.0.40
codegen_flags: <defaults>
</compile_context>

<pallas_src>
import functools

import jax
import jax.numpy as jnp
from jax.experimental import pallas as pl
from jax.experimental.pallas import tpu as pltpu

IN_FEATURES = 128 * 4 * 4   # 2048
NUM_CLASSES = 20

_SINGLE_SHOT_ROWS = 256     # batches up to this size skip the grid machinery


def _round_up(x, m):
    return (x + m - 1) // m * m


def fc_kernel(x_ref, w_ref, b_ref, o_ref):
    # x_ref: (TM, 2048) f32/bf16   w_ref: (2048, 20) bf16
    # b_ref: (1, 20)    f32        o_ref: (TM, 20)   f32
    xv = x_ref[...]
    if xv.dtype != jnp.bfloat16:
        # In-register cast (data already in VMEM) -> native bf16 MXU path.
        xv = xv.astype(jnp.bfloat16)
    o_ref[...] = (
        jnp.dot(xv, w_ref[...], preferred_element_type=jnp.float32) + b_ref[...]
    )


def prepare_params(weight, bias):
    """One-time repack of the PyTorch-layout fc1 parameters.

    weight: (NUM_CLASSES, IN_FEATURES) f32 -> (IN_FEATURES, NUM_CLASSES) bf16
    bias:   (NUM_CLASSES,)             f32 -> (1, NUM_CLASSES)           f32
    Transpose / cast happen here, off the per-forward hot path.
    """
    w_t = jnp.asarray(weight, jnp.float32).T.astype(jnp.bfloat16)
    b_row = jnp.asarray(bias, jnp.float32).reshape(1, NUM_CLASSES)
    return w_t, b_row


@functools.partial(jax.jit, static_argnames=("tm", "single_shot_rows"))
def classifier32_forward(x, w_t, b_row, *, tm=None, single_shot_rows=_SINGLE_SHOT_ROWS):
    """x: (B, 128, 4, 4) f32 or bf16 (any B). Returns logits (B, NUM_CLASSES) f32."""
    b = x.shape[0]
    x_flat = x.reshape(b, -1)          # same as torch .view(B, -1); dtype untouched
    assert x_flat.shape[1] == IN_FEATURES
    k = IN_FEATURES
    n = NUM_CLASSES
    x_bytes = jnp.dtype(x_flat.dtype).itemsize

    cost = pl.CostEstimate(
        flops=2 * b * k * n,
        transcendentals=0,
        bytes_accessed=(b * k * x_bytes) + w_t.size * 2 + b_row.size * 4 + b * n * 4,
    )

    if b <= single_shot_rows:
        # Single-shot call: no grid, no pipeline prologue/epilogue, no padding
        # (block shape == full array shape is exempt from the (8,128) rule).
        # x is at most 256 x 2048 x 4 B = 2 MiB here.
        return pl.pallas_call(
            fc_kernel,
            out_shape=jax.ShapeDtypeStruct((b, n), jnp.float32),
            in_specs=[
                pl.BlockSpec(memory_space=pltpu.MemorySpace.VMEM),
                pl.BlockSpec(memory_space=pltpu.MemorySpace.VMEM),
                pl.BlockSpec(memory_space=pltpu.MemorySpace.VMEM),
            ],
            out_specs=pl.BlockSpec(memory_space=pltpu.MemorySpace.VMEM),
            cost_estimate=cost,
        )(x_flat, w_t, b_row)

    # ---- Gridded path: tile the batch axis, stream x, keep W/bias resident.
    if tm is None:
        # bf16 halves per-tile VMEM, so it can afford the larger tile.
        tm = 2048 if x_flat.dtype == jnp.bfloat16 else 1024
    # Ensure >= 2 grid steps for mid-size batches (lets v7x's two TensorCores
    # split the rows via "parallel"); keep tm a multiple of 8 (sublane rule).
    tm = min(tm, max(8, _round_up(pl.cdiv(b, 2), 8)))
    assert tm % 8 == 0, "tm must be a multiple of 8 (sublane tiling rule)"

    # No padding of x: grid = cdiv(b, tm) and Pallas masks the ragged last
    # M block's boundary writes.
    grid_m = pl.cdiv(b, tm)

    return pl.pallas_call(
        fc_kernel,
        out_shape=jax.ShapeDtypeStruct((b, n), jnp.float32),
        grid_spec=pltpu.PrefetchScalarGridSpec(
            num_scalar_prefetch=0,
            grid=(grid_m,),
            in_specs=[
                pl.BlockSpec((tm, k), lambda i: (i, 0)),   # streamed activations
                pl.BlockSpec((k, n), lambda i: (0, 0)),    # resident weight (bf16)
                pl.BlockSpec((1, n), lambda i: (0, 0)),    # resident bias
            ],
            out_specs=pl.BlockSpec((tm, n), lambda i: (i, 0)),
        ),
        compiler_params=pltpu.CompilerParams(
            dimension_semantics=("parallel",),
            # Double-buffered x tile (<= 2 * 8 MiB) + resident weight/bias +
            # output tiles stay well under 40 MiB -> safe on v5e/v6e (128 MiB
            # physical) and v7x (64 MiB physical).
            vmem_limit_bytes=40 << 20,
        ),
        cost_estimate=cost,
    )(x_flat, w_t, b_row)


if __name__ == "__main__":
    key = jax.random.PRNGKey(0)
    k_x, k_w, k_b, k_x2 = jax.random.split(key, 4)

    # Deterministic param init (PyTorch Linear default: U(-1/sqrt(fan_in), +));
    # weights_init in the reference only touches Conv/BatchNorm, so fc1 keeps
    # its default init.
    bound = 1.0 / (IN_FEATURES ** 0.5)
    weight = jax.random.uniform(
        k_w, (NUM_CLASSES, IN_FEATURES), jnp.float32, -bound, bound
    )
    bias = jax.random.uniform(k_b, (NUM_CLASSES,), jnp.float32, -bound, bound)

    # One-time parameter repack (transpose + bf16 cast) - off the hot path.
    w_t, b_row = prepare_params(weight, bias)

    # 1) Small batch, f32 activations: single-shot path (no grid, no padding).
    x = jax.random.normal(k_x, (2, 128, 4, 4), dtype=jnp.float32)
    out = classifier32_forward(x, w_t, b_row)
    jax.block_until_ready(out)
    ref = x.reshape(2, -1) @ weight.T + bias
    assert out.shape == (2, NUM_CLASSES)
    assert jnp.allclose(out, ref, atol=5e-2, rtol=5e-2), float(jnp.abs(out - ref).max())

    # 2) Gridded path with a ragged last M block: 20 rows, tm=8 -> 3 grid
    #    steps, last block only partially valid (masked writes, no jnp.pad).
    #    Activations supplied in bf16 and streamed directly (no upcast).
    x2 = jax.random.normal(k_x2, (20, 128, 4, 4), dtype=jnp.float32).astype(jnp.bfloat16)
    out2 = classifier32_forward(x2, w_t, b_row, tm=8, single_shot_rows=0)
    jax.block_until_ready(out2)
    ref2 = x2.astype(jnp.float32).reshape(20, -1) @ weight.T + bias
    assert out2.shape == (20, NUM_CLASSES)
    assert jnp.allclose(out2, ref2, atol=1e-1, rtol=1e-1), float(jnp.abs(out2 - ref2).max())

    print("KERNEL_OK")
</pallas_src>

<mosaic_0001>
module attributes {stable_mosaic.version = 11 : i64} {
  func.func @fc_kernel(%arg0: memref<2x2048xf32, #tpu.memory_space<vmem>>, %arg1: memref<2048x20xbf16, #tpu.memory_space<vmem>>, %arg2: memref<1x20xf32, #tpu.memory_space<vmem>>, %arg3: memref<2x20xf32, #tpu.memory_space<vmem>>) attributes {dimension_semantics = [], scalar_prefetch = 0 : i64, scratch_operands = 0 : i64, tpu.core_type = #tpu.core_type<tc>} {
    %c0 = arith.constant 0 : index
    %c0_0 = arith.constant 0 : index
    %0 = vector.load %arg0[%c0, %c0_0] : memref<2x2048xf32, #tpu.memory_space<vmem>>, vector<2x2048xf32>
    %1 = arith.truncf %0 : vector<2x2048xf32> to vector<2x2048xbf16>
    %c0_1 = arith.constant 0 : index
    %c0_2 = arith.constant 0 : index
    %2 = vector.load %arg1[%c0_1, %c0_2] : memref<2048x20xbf16, #tpu.memory_space<vmem>>, vector<2048x20xbf16>
    %cst = arith.constant dense<0.000000e+00> : vector<2x20xf32>
    %3 = tpu.matmul %1, %2, %cst {dimension_numbers = #tpu.dot_dimension_numbers<[1], [0], [0], [1], [0, 0, 1, 1], [], []>} : vector<2x2048xbf16>, vector<2048x20xbf16>, vector<2x20xf32> -> vector<2x20xf32>
    %c0_3 = arith.constant 0 : index
    %c0_4 = arith.constant 0 : index
    %4 = vector.load %arg2[%c0_3, %c0_4] : memref<1x20xf32, #tpu.memory_space<vmem>>, vector<1x20xf32>
    %5 = vector.broadcast %4 : vector<1x20xf32> to vector<2x20xf32>
    %6 = arith.addf %3, %5 : vector<2x20xf32>
    %c0_5 = arith.constant 0 : index
    %c0_6 = arith.constant 0 : index
    %7 = vector.load %arg3[%c0_5, %c0_6] : memref<2x20xf32, #tpu.memory_space<vmem>>, vector<2x20xf32>
    tpu.vector_store %arg3[%c0_5, %c0_6], %6 {strides = array<i32>} : memref<2x20xf32, #tpu.memory_space<vmem>>, vector<2x20xf32>,
    return
  }
}

</mosaic_0001>

<bundles_post_ra>
// kernel: classifier32_forward.1
= control target key start
LH: loop header
LB: loop body
LE: loop exit
PB: predicated region body
PF: predicated region fallthrough
CT: control target
= control target key end

     0   :  { %v28_v28 = vlaneseq  ;;  %v1954_v36 = vmov 1983009808   ;;  %s2397_s0 = inlined_call_operand.vmem [shape: f32[2,2048], index: 0, kind: input, shape index: {}]   ;;  %s2398_s1 = inlined_call_operand.vmem [shape: bf16[2048,20], index: 1, kind: input, shape index: {}]   ;;  %s2399_s2 = inlined_call_operand.vmem [shape: f32[1,20], index: 2, kind: input, shape index: {}]   ;;  %s2400_s3 = inlined_call_operand.hbm [shape: f32[2,20], index: 3, kind: output, shape index: {}]  }
   0x1   :  { %v1798_v0 = vld [vmem:[%s2398_s1 + $0x40] sm:$0xff]   ;;  %v1802_v4 = vld [vmem:[%s2398_s1 + $0x48] sm:$0xff]   ;;  %v1806_v8 = vld [vmem:[%s2398_s1 + $0x50] sm:$0xff]   ;;  %v26_v37 = vunpack.c.l.s4 %v1954_v36 }
   0x2   :  { %v1799_v1 = vld [vmem:[%s2398_s1 + $0xc0] sm:$0xff]   ;;  %1620 = vmatprep.subr.bf16.mxu0 %v1798_v0  ;;  %v1803_v5 = vld [vmem:[%s2398_s1 + $0xc8] sm:$0xff]   ;;  %v1807_v9 = vld [vmem:[%s2398_s1 + $0xd0] sm:$0xff]   ;;  %v29_v33 = vshrl.u32 %v28_v28, 7 }
   0x3   :  { %v1800_v2 = vld [vmem:[%s2398_s1] sm:$0xff]   ;;  %1642 = vmatprep.subr.bf16.mxu1 %v1799_v1  ;;  %v1804_v6 = vld [vmem:[%s2398_s1 + $0x8] sm:$0xff]   ;;  %v1808_v10 = vld [vmem:[%s2398_s1 + $0x10] sm:$0xff]   ;;  %v27_v39 = vunpack.c.0.s8 %v26_v37 }
   0x4   :  { %v1801_v3 = vld [vmem:[%s2398_s1 + $0x80] sm:$0xff]   ;;  %1621 = vmatpush3.bf16.msra.mxu0 %v1800_v2  ;;  %v1805_v7 = vld [vmem:[%s2398_s1 + $0x88] sm:$0xff]   ;;  %v1809_v11 = vld [vmem:[%s2398_s1 + $0x90] sm:$0xff]  }
   0x5   :  { %1643 = vmatpush3.bf16.msra.mxu1 %v1801_v3  ;;  %1622 = vmatprep.subr.bf16.mxu0 %v1802_v4  ;;  %v1810_v12 = vld [vmem:[%s2398_s1 + $0x58] sm:$0xff]   ;;  %v1814_v16 = vld [vmem:[%s2398_s1 + $0x60] sm:$0xff]   ;;  %v1818_v20 = vld [vmem:[%s2398_s1 + $0x68] sm:$0xff]   ;;  %v2081_v41 = vsub.s32 %v27_v39, %v29_v33 }
   0x6   :  { %1644 = vmatprep.subr.bf16.mxu1 %v1803_v5  ;;  %v1811_v13 = vld [vmem:[%s2398_s1 + $0xd8] sm:$0xff]   ;;  %v1815_v17 = vld [vmem:[%s2398_s1 + $0xe0] sm:$0xff]   ;;  %v1819_v21 = vld [vmem:[%s2398_s1 + $0xe8] sm:$0xff]  }
   0x7   :  { %v1812_v14 = vld [vmem:[%s2398_s1 + $0x18] sm:$0xff]   ;;  %v1816_v18 = vld [vmem:[%s2398_s1 + $0x20] sm:$0xff]   ;;  %v1820_v22 = vld [vmem:[%s2398_s1 + $0x28] sm:$0xff]  }
   0x8   :  { %1623 = vmatpush3.bf16.msra.mxu0 %v1804_v6  ;;  %v1813_v15 = vld [vmem:[%s2398_s1 + $0x98] sm:$0xff]   ;;  %v1817_v19 = vld [vmem:[%s2398_s1 + $0xa0] sm:$0xff]   ;;  %v1821_v23 = vld [vmem:[%s2398_s1 + $0xa8] sm:$0xff]  }
   0x9   :  { %1645 = vmatpush3.bf16.msra.mxu1 %v1805_v7  ;;  %1624 = vmatprep.subr.bf16.mxu0 %v1806_v8  ;;  %v1822_v24 = vld [vmem:[%s2398_s1 + $0x70] sm:$0xff]   ;;  %v1826_v29 = vld [vmem:[%s2398_s1 + $0x78] sm:$0xff]   ;;  %v16_v34 = vld [vmem:[%s2397_s0] sm:$0xff] }
   0xa   :  { %1646 = vmatprep.subr.bf16.mxu1 %v1807_v9  ;;  %v1823_v25 = vld [vmem:[%s2398_s1 + $0xf0] sm:$0xff]   ;;  %v1827_v30 = vld [vmem:[%s2398_s1 + $0xf8] sm:$0xff]   ;;  %v1831_v35 = vld [vmem:[%s2398_s1 + $0x140] sm:$0xff]   ;;  %v24_v40 = vcombine.high %v16_v34, %v16_v34  ;;  %v31_v42 = vrot.slane %v16_v34, %v2081_v41 }
   0xb   :  { %v1824_v26 = vld [vmem:[%s2398_s1 + $0x30] sm:$0xff]   ;;  %v1828_v31 = vld [vmem:[%s2398_s1 + $0x38] sm:$0xff]   ;;  %v1832_v38 = vld [vmem:[%s2398_s1 + $0x1c0] sm:$0xff]  }
   0xc   :  { %1625 = vmatpush3.bf16.msra.mxu0 %v1808_v10  ;;  %v1825_v27 = vld [vmem:[%s2398_s1 + $0xb0] sm:$0xff]   ;;  %v1829_v32 = vld [vmem:[%s2398_s1 + $0xb8] sm:$0xff]   ;;  %v38_v43 = vrot.slane %v24_v40, %v2081_v41  ;;  %v39_v44 = vcombine.high %v31_v42, %v31_v42  ;;  %v1833_v46 = vld [vmem:[%s2398_s1 + $0x100] sm:$0xff]   ;;  %v108_v47 = vpack.c.bf16 %v31_v42, %v31_v42 }
   0xd   :  { %1647 = vmatpush3.bf16.msra.mxu1 %v1809_v11  ;;  %1626 = vmatprep.subr.bf16.mxu0 %v1810_v12  ;;  %v1834_v49 = vld [vmem:[%s2398_s1 + $0x180] sm:$0xff]   ;;  %v1835_v52 = vld [vmem:[%s2398_s1 + $0x148] sm:$0xff]   ;;  %v1839_v56 = vld [vmem:[%s2398_s1 + $0x150] sm:$0xff]  }
   0xe   :  { %1648 = vmatprep.subr.bf16.mxu1 %v1811_v13  ;;  %v40_v45 = vcombine.high %v38_v43, %v38_v43  ;;  %v110_v48 = vpack.c.bf16 %v38_v43, %v38_v43  ;;  %v109_v50 = vpack.c.bf16 %v39_v44, %v39_v44  ;;  %v1836_v53 = vld [vmem:[%s2398_s1 + $0x1c8] sm:$0xff]   ;;  %v1840_v57 = vld [vmem:[%s2398_s1 + $0x1d0] sm:$0xff]   ;;  %v1843_v60 = vld [vmem:[%s2398_s1 + $0x158] sm:$0xff]  }
   0xf   :  { %v1837_v54 = vld [vmem:[%s2398_s1 + $0x108] sm:$0xff]   ;;  %v1841_v58 = vld [vmem:[%s2398_s1 + $0x110] sm:$0xff]   ;;  %v1844_v61 = vld [vmem:[%s2398_s1 + $0x1d8] sm:$0xff]  }
  0x10   :  { %1627 = vmatpush3.bf16.msra.mxu0 %v1812_v14  ;;  %v111_v51 = vpack.c.bf16 %v40_v45, %v40_v45  ;;  %1187 = vmatprep.mubr.bf16.mxu0 %v109_v50  ;;  %v1838_v55 = vld [vmem:[%s2398_s1 + $0x188] sm:$0xff]   ;;  %v1842_v59 = vld [vmem:[%s2398_s1 + $0x190] sm:$0xff]   ;;  %v1845_v62 = vld [vmem:[%s2398_s1 + $0x118] sm:$0xff]  }
  0x11   :  { %1649 = vmatpush3.bf16.msra.mxu1 %v1813_v15  ;;  %1628 = vmatprep.subr.bf16.mxu0 %v1814_v16  ;;  %v1846_v63 = vld [vmem:[%s2398_s1 + $0x198] sm:$0xff]   ;;  %v1847_v0 = vld [vmem:[%s2398_s1 + $0x160] sm:$0xff]   ;;  %v1851_v4 = vld [vmem:[%s2398_s1 + $0x168] sm:$0xff]  }
  0x12   :  { %1650 = vmatprep.subr.bf16.mxu1 %v1815_v17  ;;  %1227 = vmatprep.mubr.bf16.mxu1 %v111_v51  ;;  %v1848_v1 = vld [vmem:[%s2398_s1 + $0x1e0] sm:$0xff]   ;;  %v1852_v5 = vld [vmem:[%s2398_s1 + $0x1e8] sm:$0xff]   ;;  %v1855_v8 = vld [vmem:[%s2398_s1 + $0x170] sm:$0xff]  }
  0x13   :  { %v1849_v2 = vld [vmem:[%s2398_s1 + $0x120] sm:$0xff]   ;;  %v1853_v6 = vld [vmem:[%s2398_s1 + $0x128] sm:$0xff]   ;;  %v1856_v9 = vld [vmem:[%s2398_s1 + $0x1f0] sm:$0xff]  }
  0x14   :  { %1629 = vmatpush3.bf16.msra.mxu0 %v1816_v18  ;;  %v1850_v3 = vld [vmem:[%s2398_s1 + $0x1a0] sm:$0xff]   ;;  %v1854_v7 = vld [vmem:[%s2398_s1 + $0x1a8] sm:$0xff]   ;;  %v1857_v11 = vld [vmem:[%s2398_s1 + $0x130] sm:$0xff]  }
  0x15   :  { %1651 = vmatpush3.bf16.msra.mxu1 %v1817_v19  ;;  %1630 = vmatprep.subr.bf16.mxu0 %v1818_v20  ;;  %v17_v10 = vld [vmem:[%s2397_s0 + $0x8] sm:$0xff]  ;;  %v1858_v14 = vld [vmem:[%s2398_s1 + $0x1b0] sm:$0xff]   ;;  %v1859_v15 = vld [vmem:[%s2398_s1 + $0x178] sm:$0xff]  }
  0x16   :  { %1652 = vmatprep.subr.bf16.mxu1 %v1819_v21  ;;  %v48_v12 = vrot.slane %v17_v10, %v2081_v41  ;;  %v41_v13 = vcombine.high %v17_v10, %v17_v10  ;;  %v1860_v18 = vld [vmem:[%s2398_s1 + $0x1f8] sm:$0xff]   ;;  %v1871_v33 = vld [vmem:[%s2398_s1 + $0x288] sm:$0xff]   ;;  %v1872_v34 = vld [vmem:[%s2398_s1 + $0x250] sm:$0xff]  }
  0x17   :  { %v1861_v19 = vld [vmem:[%s2398_s1 + $0x138] sm:$0xff]   ;;  %v1874_v36 = vld [vmem:[%s2398_s1 + $0x210] sm:$0xff]   ;;  %v1880_v43 = vld [vmem:[%s2398_s1 + $0x260] sm:$0xff]  }
  0x18   :  { %1631 = vmatpush3.bf16.msra.mxu0 %v1820_v22  ;;  %v56_v16 = vcombine.high %v48_v12, %v48_v12  ;;  %v55_v17 = vrot.slane %v41_v13, %v2081_v41  ;;  %v1862_v22 = vld [vmem:[%s2398_s1 + $0x1b8] sm:$0xff]   ;;  %v1875_v37 = vld [vmem:[%s2398_s1 + $0x290] sm:$0xff]   ;;  %v1881_v44 = vld [vmem:[%s2398_s1 + $0x2e0] sm:$0xff]  }
  0x19   :  { %1653 = vmatpush3.bf16.msra.mxu1 %v1821_v23  ;;  %1632 = vmatprep.subr.bf16.mxu0 %v1822_v24  ;;  %v1864_v24 = vld [vmem:[%s2398_s1 + $0x240] sm:$0xff]   ;;  %v1877_v39 = vld [vmem:[%s2398_s1 + $0x2d8] sm:$0xff]   ;;  %v1887_v50 = vld [vmem:[%s2398_s1 + $0x2a8] sm:$0xff]  }
  0x1a   :  { %1654 = vmatprep.subr.bf16.mxu1 %v1823_v25  ;;  %v113_v20 = vpack.c.bf16 %v56_v16, %v56_v16  ;;  %v57_v21 = vcombine.high %v55_v17, %v55_v17  ;;  %v1865_v25 = vld [vmem:[%s2398_s1 + $0x2c0] sm:$0xff]   ;;  %v114_v28 = vpack.c.bf16 %v55_v17, %v55_v17  ;;  %v1878_v40 = vld [vmem:[%s2398_s1 + $0x218] sm:$0xff]   ;;  %v1888_v51 = vld [vmem:[%s2398_s1 + $0x270] sm:$0xff]  }
  0x1b   :  { %v1879_v42 = vld [vmem:[%s2398_s1 + $0x298] sm:$0xff]   ;;  %v1882_v45 = vld [vmem:[%s2398_s1 + $0x220] sm:$0xff]   ;;  %v1902_v10 = vld [vmem:[%s2398_s1 + $0x3c8] sm:$0xff]  }
  0x1c   :  { %1633 = vmatpush3.bf16.msra.mxu0 %v1824_v26  ;;  %v115_v23 = vpack.c.bf16 %v57_v21, %v57_v21  ;;  %v1866_v26 = vld [vmem:[%s2398_s1 + $0x200] sm:$0xff]   ;;  %v1905_v13 = vld [vmem:[%s2398_s1 + $0x350] sm:$0xff]   ;;  %v1909_v17 = vld [vmem:[%s2398_s1 + $0x358] sm:$0xff]  }
  0x1d   :  { %1655 = vmatpush3.bf16.msra.mxu1 %v1825_v27  ;;  %1634 = vmatprep.subr.bf16.mxu0 %v1826_v29  ;;  %v112_v27 = vpack.c.bf16 %v48_v12, %v48_v12  ;;  %v1867_v29 = vld [vmem:[%s2398_s1 + $0x280] sm:$0xff]   ;;  %v1904_v12 = vld [vmem:[%s2398_s1 + $0x388] sm:$0xff]   ;;  %v1908_v16 = vld [vmem:[%s2398_s1 + $0x390] sm:$0xff]  }
  0x1e   :  { %1656 = vmatprep.subr.bf16.mxu1 %v1827_v30  ;;  %v1868_v30 = vld [vmem:[%s2398_s1 + $0x248] sm:$0xff]   ;;  %v1913_v21 = vld [vmem:[%s2398_s1 + $0x360] sm:$0xff]  }
  0x20   :  { %1635 = vmatpush3.bf16.msra.mxu0 %v1828_v31  ;;  %v1869_v31 = vld [vmem:[%s2398_s1 + $0x2c8] sm:$0xff]  }
  0x21   :  { %1657 = vmatpush3.bf16.msra.mxu1 %v1829_v32  ;;  %1664 = vmatprep.subr.bf16.mxu0 %v1831_v35  ;;  %v1870_v32 = vld [vmem:[%s2398_s1 + $0x208] sm:$0xff]   ;;  %v1873_v35 = vld [vmem:[%s2398_s1 + $0x2d0] sm:$0xff]  }
  0x22   :  { %1686 = vmatprep.subr.bf16.mxu1 %v1832_v38  ;;  %v1876_v38 = vld [vmem:[%s2398_s1 + $0x258] sm:$0xff]  }
  0x23   :  { %1188 = vmatmul.mubr.bf16.vlgmr.msra.gmra.mrb[0].mxu0 %v108_v47  ;;  %v1884_v47 = vld [vmem:[%s2398_s1 + $0x268] sm:$0xff]  }
  0x24   :  { %1228 = vmatmul.mubr.bf16.vlgmr.msra.gmra.mrb[0].mxu1 %v110_v48  ;;  %1665 = vmatpush3.bf16.msra.mxu0 %v1833_v46  ;;  %v1883_v46 = vld [vmem:[%s2398_s1 + $0x2a0] sm:$0xff]   ;;  %v1885_v48 = vld [vmem:[%s2398_s1 + $0x2e8] sm:$0xff]  }
  0x25   :  { %1687 = vmatpush3.bf16.msra.mxu1 %v1834_v49  ;;  %1666 = vmatprep.subr.bf16.mxu0 %v1835_v52  ;;  %v1886_v49 = vld [vmem:[%s2398_s1 + $0x228] sm:$0xff]   ;;  %v1889_v52 = vld [vmem:[%s2398_s1 + $0x2f0] sm:$0xff]  }
  0x26   :  { %1688 = vmatprep.subr.bf16.mxu1 %v1836_v53  ;;  %1267 = vmatprep.mubr.bf16.mxu0 %v113_v20  ;;  %v18_v53 = vld [vmem:[%s2397_s0 + $0x10] sm:$0xff]  ;;  %v1912_v20 = vld [vmem:[%s2398_s1 + $0x398] sm:$0xff]  }
  0x27   :  { %1307 = vmatprep.mubr.bf16.mxu1 %v115_v23  ;;  %v1915_v23 = vld [vmem:[%s2398_s1 + $0x320] sm:$0xff]  }
  0x28   :  { %1667 = vmatpush3.bf16.msra.mxu0 %v1837_v54  ;;  %v1890_v54 = vld [vmem:[%s2398_s1 + $0x230] sm:$0xff]  }
  0x29   :  { %1689 = vmatpush3.bf16.msra.mxu1 %v1838_v55  ;;  %1668 = vmatprep.subr.bf16.mxu0 %v1839_v56  ;;  %v65_v55 = vrot.slane %v18_v53, %v2081_v41  ;;  %v58_v56 = vcombine.high %v18_v53, %v18_v53 }
  0x2a   :  { %1690 = vmatprep.subr.bf16.mxu1 %v1840_v57  ;;  %v1891_v57 = vld [vmem:[%s2398_s1 + $0x2b0] sm:$0xff]  }
  0x2c   :  { %1669 = vmatpush3.bf16.msra.mxu0 %v1841_v58  ;;  %v1892_v58 = vld [vmem:[%s2398_s1 + $0x278] sm:$0xff]  }
  0x2d   :  { %1691 = vmatpush3.bf16.msra.mxu1 %v1842_v59  ;;  %1670 = vmatprep.subr.bf16.mxu0 %v1843_v60  ;;  %v73_v59 = vcombine.high %v65_v55, %v65_v55  ;;  %v72_v60 = vrot.slane %v58_v56, %v2081_v41 }
  0x2e   :  { %1692 = vmatprep.subr.bf16.mxu1 %v1844_v61  ;;  %v1893_v61 = vld [vmem:[%s2398_s1 + $0x2f8] sm:$0xff]  }
  0x30   :  { %1671 = vmatpush3.bf16.msra.mxu0 %v1845_v62  ;;  %v1894_v62 = vld [vmem:[%s2398_s1 + $0x238] sm:$0xff]  }
  0x31   :  { %1693 = vmatpush3.bf16.msra.mxu1 %v1846_v63  ;;  %1672 = vmatprep.subr.bf16.mxu0 %v1847_v0  ;;  %v117_v63 = vpack.c.bf16 %v73_v59, %v73_v59  ;;  %v74_v0 = vcombine.high %v72_v60, %v72_v60 }
  0x32   :  { %1694 = vmatprep.subr.bf16.mxu1 %v1848_v1  ;;  %v1895_v1 = vld [vmem:[%s2398_s1 + $0x2b8] sm:$0xff]  }
  0x34   :  { %1673 = vmatpush3.bf16.msra.mxu0 %v1849_v2  ;;  %v119_v2 = vpack.c.bf16 %v74_v0, %v74_v0 }
  0x35   :  { %1695 = vmatpush3.bf16.msra.mxu1 %v1850_v3  ;;  %1674 = vmatprep.subr.bf16.mxu0 %v1851_v4  ;;  %v1897_v3 = vld [vmem:[%s2398_s1 + $0x340] sm:$0xff]  }
  0x36   :  { %1696 = vmatprep.subr.bf16.mxu1 %v1852_v5  ;;  %v1898_v4 = vld [vmem:[%s2398_s1 + $0x3c0] sm:$0xff]  }
  0x37   :  { %v1899_v5 = vld [vmem:[%s2398_s1 + $0x300] sm:$0xff]  }
  0x38   :  { %1675 = vmatpush3.bf16.msra.mxu0 %v1853_v6  ;;  %v116_v6 = vpack.c.bf16 %v65_v55, %v65_v55 }
  0x39   :  { %1697 = vmatpush3.bf16.msra.mxu1 %v1854_v7  ;;  %1676 = vmatprep.subr.bf16.mxu0 %v1855_v8  ;;  %v118_v7 = vpack.c.bf16 %v72_v60, %v72_v60  ;;  %v1900_v8 = vld [vmem:[%s2398_s1 + $0x380] sm:$0xff]  }
  0x3a   :  { %1698 = vmatprep.subr.bf16.mxu1 %v1856_v9  ;;  %v1901_v9 = vld [vmem:[%s2398_s1 + $0x348] sm:$0xff]  }
  0x3c   :  { %1677 = vmatpush3.bf16.msra.mxu0 %v1857_v11  ;;  %v1903_v11 = vld [vmem:[%s2398_s1 + $0x308] sm:$0xff]  }
  0x3d   :  { %1699 = vmatpush3.bf16.msra.mxu1 %v1858_v14  ;;  %1678 = vmatprep.subr.bf16.mxu0 %v1859_v15  ;;  %v1906_v14 = vld [vmem:[%s2398_s1 + $0x3d0] sm:$0xff]  }
  0x3e   :  { %1700 = vmatprep.subr.bf16.mxu1 %v1860_v18  ;;  %v1907_v15 = vld [vmem:[%s2398_s1 + $0x310] sm:$0xff]   ;;  %v1910_v18 = vld [vmem:[%s2398_s1 + $0x3d8] sm:$0xff]  }
  0x40   :  { %1679 = vmatpush3.bf16.msra.mxu0 %v1861_v19  ;;  %v1911_v19 = vld [vmem:[%s2398_s1 + $0x318] sm:$0xff]  }
  0x41   :  { %1701 = vmatpush3.bf16.msra.mxu1 %v1862_v22  ;;  %1708 = vmatprep.subr.bf16.mxu0 %v1864_v24  ;;  %v1914_v22 = vld [vmem:[%s2398_s1 + $0x3e0] sm:$0xff]  }
  0x42   :  { %1730 = vmatprep.subr.bf16.mxu1 %v1865_v25  ;;  %v1916_v24 = vld [vmem:[%s2398_s1 + $0x3a0] sm:$0xff]   ;;  %v1917_v25 = vld [vmem:[%s2398_s1 + $0x368] sm:$0xff]  }
  0x43   :  { %1268 = vmatmul.mubr.bf16.vlgmr.msra.gmra.mrb[4].mxu0 %v112_v27  ;;  %v1919_v27 = vld [vmem:[%s2398_s1 + $0x328] sm:$0xff]  }
  0x44   :  { %1308 = vmatmul.mubr.bf16.vlgmr.msra.gmra.mrb[4].mxu1 %v114_v28  ;;  %1709 = vmatpush3.bf16.msra.mxu0 %v1866_v26  ;;  %v1918_v26 = vld [vmem:[%s2398_s1 + $0x3e8] sm:$0xff]  }
  0x45   :  { %1731 = vmatpush3.bf16.msra.mxu1 %v1867_v29  ;;  %1710 = vmatprep.subr.bf16.mxu0 %v1868_v30  ;;  %v1920_v28 = vld [vmem:[%s2398_s1 + $0x3a8] sm:$0xff]   ;;  %v1921_v29 = vld [vmem:[%s2398_s1 + $0x370] sm:$0xff]  }
  0x46   :  { %1732 = vmatprep.subr.bf16.mxu1 %v1869_v31  ;;  %1347 = vmatprep.mubr.bf16.mxu0 %v117_v63  ;;  %v1922_v30 = vld [vmem:[%s2398_s1 + $0x3f0] sm:$0xff]   ;;  %v19_v31 = vld [vmem:[%s2397_s0 + $0x18] sm:$0xff] }
  0x47   :  { %1387 = vmatprep.mubr.bf16.mxu1 %v119_v2 }
  0x48   :  { %1711 = vmatpush3.bf16.msra.mxu0 %v1870_v32 }
  0x49   :  { %1733 = vmatpush3.bf16.msra.mxu1 %v1871_v33  ;;  %1712 = vmatprep.subr.bf16.mxu0 %v1872_v34 }
  0x4a   :  { %1734 = vmatprep.subr.bf16.mxu1 %v1873_v35 }
  0x4c   :  { %1713 = vmatpush3.bf16.msra.mxu0 %v1874_v36 }
  0x4d   :  { %1735 = vmatpush3.bf16.msra.mxu1 %v1875_v37  ;;  %1714 = vmatprep.subr.bf16.mxu0 %v1876_v38 }
  0x4e   :  { %1736 = vmatprep.subr.bf16.mxu1 %v1877_v39 }
  0x50   :  { %1715 = vmatpush3.bf16.msra.mxu0 %v1878_v40 }
  0x51   :  { %1737 = vmatpush3.bf16.msra.mxu1 %v1879_v42  ;;  %1716 = vmatprep.subr.bf16.mxu0 %v1880_v43 }
  0x52   :  { %1738 = vmatprep.subr.bf16.mxu1 %v1881_v44 }
  0x54   :  { %1717 = vmatpush3.bf16.msra.mxu0 %v1882_v45 }
  0x55   :  { %1739 = vmatpush3.bf16.msra.mxu1 %v1883_v46  ;;  %1718 = vmatprep.subr.bf16.mxu0 %v1884_v47 }
  0x56   :  { %1740 = vmatprep.subr.bf16.mxu1 %v1885_v48 }
  0x58   :  { %1719 = vmatpush3.bf16.msra.mxu0 %v1886_v49 }
  0x59   :  { %1741 = vmatpush3.bf16.msra.mxu1 %v1887_v50  ;;  %1720 = vmatprep.subr.bf16.mxu0 %v1888_v51 }
  0x5a   :  { %1742 = vmatprep.subr.bf16.mxu1 %v1889_v52 }
  0x5c   :  { %1721 = vmatpush3.bf16.msra.mxu0 %v1890_v54 }
  0x5d   :  { %1743 = vmatpush3.bf16.msra.mxu1 %v1891_v57  ;;  %1722 = vmatprep.subr.bf16.mxu0 %v1892_v58 }
  0x5e   :  { %1744 = vmatprep.subr.bf16.mxu1 %v1893_v61 }
  0x60   :  { %1723 = vmatpush3.bf16.msra.mxu0 %v1894_v62 }
  0x61   :  { %1745 = vmatpush3.bf16.msra.mxu1 %v1895_v1  ;;  %1752 = vmatprep.subr.bf16.mxu0 %v1897_v3 }
  0x62   :  { %1774 = vmatprep.subr.bf16.mxu1 %v1898_v4 }
  0x63   :  { %1348 = vmatmul.mubr.bf16.vlgmr.msra.gmra.mrb[8].mxu0 %v116_v6 }
  0x64   :  { %1388 = vmatmul.mubr.bf16.vlgmr.msra.gmra.mrb[8].mxu1 %v118_v7  ;;  %1753 = vmatpush3.bf16.msra.mxu0 %v1899_v5 }
  0x65   :  { %1775 = vmatpush3.bf16.msra.mxu1 %v1900_v8  ;;  %1754 = vmatprep.subr.bf16.mxu0 %v1901_v9 }
  0x66   :  { %1776 = vmatprep.subr.bf16.mxu1 %v1902_v10 }
  0x68   :  { %1755 = vmatpush3.bf16.msra.mxu0 %v1903_v11 }
  0x69   :  { %1777 = vmatpush3.bf16.msra.mxu1 %v1904_v12  ;;  %1756 = vmatprep.subr.bf16.mxu0 %v1905_v13 }
  0x6a   :  { %1778 = vmatprep.subr.bf16.mxu1 %v1906_v14 }
  0x6c   :  { %1757 = vmatpush3.bf16.msra.mxu0 %v1907_v15 }
  0x6d   :  { %1779 = vmatpush3.bf16.msra.mxu1 %v1908_v16  ;;  %1758 = vmatprep.subr.bf16.mxu0 %v1909_v17 }
  0x6e   :  { %1780 = vmatprep.subr.bf16.mxu1 %v1910_v18 }
  0x70   :  { %1759 = vmatpush3.bf16.msra.mxu0 %v1911_v19 }
  0x71   :  { %1781 = vmatpush3.bf16.msra.mxu1 %v1912_v20  ;;  %1760 = vmatprep.subr.bf16.mxu0 %v1913_v21 }
  0x72   :  { %1782 = vmatprep.subr.bf16.mxu1 %v1914_v22 }
  0x74   :  { %1761 = vmatpush3.bf16.msra.mxu0 %v1915_v23 }
  0x75   :  { %1783 = vmatpush3.bf16.msra.mxu1 %v1916_v24  ;;  %1762 = vmatprep.subr.bf16.mxu0 %v1917_v25 }
  0x76   :  { %1784 = vmatprep.subr.bf16.mxu1 %v1918_v26 }
  0x77   :  { %8 = vsyncpa [#allocation3], 0  ;;  %v82_v32 = vrot.slane %v19_v31, %v2081_v41  ;;  %v75_v33 = vcombine.high %v19_v31, %v19_v31  ;;  %v1923_v34 = vld [vmem:[%s2398_s1 + $0x330] sm:$0xff]   ;;  %v1925_v36 = vld [vmem:[%s2398_s1 + $0x378] sm:$0xff]   ;;  %vm1475_vm0 = vcmask 156672  }
  0x78   :  { %1763 = vmatpush3.bf16.msra.mxu0 %v1919_v27  ;;  %v1924_v35 = vld [vmem:[%s2398_s1 + $0x3b0] sm:$0xff]   ;;  %v1926_v37 = vld [vmem:[%s2398_s1 + $0x3f8] sm:$0xff]   ;;  %v1491_v49 = vld [vmem:[%s2399_s2] ss:$0 sm:$0xff] }
  0x79   :  { %1785 = vmatpush3.bf16.msra.mxu1 %v1920_v28  ;;  %1764 = vmatprep.subr.bf16.mxu0 %v1921_v29  ;;  %v90_v38 = vcombine.high %v82_v32, %v82_v32  ;;  %v89_v39 = vrot.slane %v75_v33, %v2081_v41  ;;  %v1927_v43 = vld [vmem:[%s2398_s1 + $0x338] sm:$0xff]   ;;  %v120_v46 = vpack.c.bf16 %v82_v32, %v82_v32 }
  0x7a   :  { %1786 = vmatprep.subr.bf16.mxu1 %v1922_v30  ;;  %v1928_v44 = vld [vmem:[%s2398_s1 + $0x3b8] sm:$0xff]   ;;  %s1955_s1 = smov [#allocation2]  }
  0x7b   :  { %v121_v40 = vpack.c.bf16 %v90_v38, %v90_v38  ;;  %v91_v42 = vcombine.high %v89_v39, %v89_v39  ;;  %v122_v47 = vpack.c.bf16 %v89_v39, %v89_v39  ;;  %s1483_s2 = sshll.u32 %s1955_s1, 4  ;;  %s1484_s2 = int_to_ptr.vmem [resolvable:$true] %s1483_s2 }
  0x7c   :  { %1765 = vmatpush3.bf16.msra.mxu0 %v1923_v34  ;;  %s1930_s7 = scalar_lea.vmem %s1484_s2, 32  ;;  %p1935_p1 = scmp.lt.s32.totalorder %s1484_s2, %s1484_s2 }
  0x7d   :  { %1787 = vmatpush3.bf16.msra.mxu1 %v1924_v35  ;;  %1766 = vmatprep.subr.bf16.mxu0 %v1925_v36  ;;  %v123_v45 = vpack.c.bf16 %v91_v42, %v91_v42  ;;  %p1931_p0 = scmp.ne.s32.totalorder %s1484_s2, %s1930_s7  ;;  %p1936_p2 = scmp.lt.s32.totalorder %s1930_s7, %s1930_s7 }
  0x7e   :  { %1788 = vmatprep.subr.bf16.mxu1 %v1926_v37  ;;  %1427 = vmatprep.mubr.bf16.mxu0 %v121_v40 }
  0x7f   :  { %1467 = vmatprep.mubr.bf16.mxu1 %v123_v45  ;;  %p1937_p3 = por %p1936_p2, %p1935_p1 }
  0x80   :  { %1767 = vmatpush3.bf16.msra.mxu0 %v1927_v43 }
  0x81   :  { %1789 = vmatpush3.bf16.msra.mxu1 %v1928_v44  ;;  %p1938_p4 = pnand %p1937_p3, %p1931_p0 }
  0x83   :  { %1428 = vmatmul.mubr.bf16.vlgmr.msra.gmra.mrb[12].mxu0 %v120_v46 }
  0x84   :  { %1468 = vmatmul.mubr.bf16.vlgmr.msra.gmra.mrb[12].mxu1 %v122_v47 }
  0xf6   :  { %v1636_v41 = vpop.f32.mrb[0].mxu0 }
  0xf7   :  { %v1658_v48 = vpop.f32.mrb[0].mxu1  ;;  %v1637_v50 = vpop.f32.mrb[1].mxu0 }
  0xf8   :  { %v1659_v51 = vpop.f32.mrb[1].mxu1  ;;  %v1638_v52 = vadd.f32 %v1637_v50, %v1636_v41  ;;  %v1639_v54 = vpop.f32.mrb[2].mxu0 }
  0xf9   :  { %v1660_v53 = vadd.f32 %v1659_v51, %v1658_v48  ;;  %v1661_v55 = vpop.f32.mrb[2].mxu1  ;;  %v1640_v56 = vpop.f32.mrb[3].mxu0 }
  0xfa   :  { %v1662_v57 = vpop.f32.mrb[3].mxu1  ;;  %v1190_v58 = vadd.f32 %v1638_v52, %v1491_v49 }
  0xfc   :  { %v1230_v59 = vadd.f32 %v1660_v53, %v1190_v58 }
 0x116   :  { %v1680_v60 = vpop.f32.mrb[4].mxu0 }
 0x117   :  { %v1702_v61 = vpop.f32.mrb[4].mxu1  ;;  %v1681_v62 = vpop.f32.mrb[5].mxu0 }
 0x118   :  { %v1703_v63 = vpop.f32.mrb[5].mxu1  ;;  %v1682_v0 = vadd.f32 %v1681_v62, %v1680_v60  ;;  %v1683_v2 = vpop.f32.mrb[6].mxu0 }
 0x119   :  { %v1704_v1 = vadd.f32 %v1703_v63, %v1702_v61  ;;  %v1705_v3 = vpop.f32.mrb[6].mxu1  ;;  %v1684_v4 = vpop.f32.mrb[7].mxu0 }
 0x11a   :  { %v1706_v5 = vpop.f32.mrb[7].mxu1  ;;  %v1270_v6 = vadd.f32 %v1682_v0, %v1230_v59 }
 0x11c   :  { %v1310_v7 = vadd.f32 %v1704_v1, %v1270_v6 }
 0x136   :  { %v1724_v8 = vpop.f32.mrb[8].mxu0 }
 0x137   :  { %v1746_v9 = vpop.f32.mrb[8].mxu1  ;;  %v1725_v10 = vpop.f32.mrb[9].mxu0 }
 0x138   :  { %v1747_v11 = vpop.f32.mrb[9].mxu1  ;;  %v1726_v12 = vadd.f32 %v1725_v10, %v1724_v8  ;;  %v1727_v14 = vpop.f32.mrb[10].mxu0 }
 0x139   :  { %v1748_v13 = vadd.f32 %v1747_v11, %v1746_v9  ;;  %v1749_v15 = vpop.f32.mrb[10].mxu1  ;;  %v1728_v16 = vpop.f32.mrb[11].mxu0 }
 0x13a   :  { %v1750_v17 = vpop.f32.mrb[11].mxu1  ;;  %v1350_v18 = vadd.f32 %v1726_v12, %v1310_v7 }
 0x13c   :  { %v1390_v19 = vadd.f32 %v1748_v13, %v1350_v18 }
 0x156   :  { %v1768_v20 = vpop.f32.mrb[12].mxu0 }
 0x157   :  { %v1790_v21 = vpop.f32.mrb[12].mxu1  ;;  %v1769_v22 = vpop.f32.mrb[13].mxu0 }
 0x158   :  { %v1791_v23 = vpop.f32.mrb[13].mxu1  ;;  %v1770_v24 = vadd.f32 %v1769_v22, %v1768_v20  ;;  %v1771_v26 = vpop.f32.mrb[14].mxu0 }
 0x159   :  { %v1792_v25 = vadd.f32 %v1791_v23, %v1790_v21  ;;  %v1793_v27 = vpop.f32.mrb[14].mxu1  ;;  %v1772_v28 = vpop.f32.mrb[15].mxu0 }
 0x15a   :  { %v1794_v29 = vpop.f32.mrb[15].mxu1  ;;  %v1430_v30 = vadd.f32 %v1770_v24, %v1390_v19 }
 0x15c   :  { %v1470_v31 = vadd.f32 %v1792_v25, %v1430_v30 }
 0x15e   :  { %1476 = vst.msk [vmem:[#allocation2] sm:$0x3] %vm1475_vm0, %v1470_v31 }
 0x15f   :  { %1941 = shalt.err (!%p1938_p4)
}
 0x160   :  { %s1942_s10 = scalar_lea.hbm %s2400_s3, 32 }
 0x161   :  { %p1943_p5 = scmp.ne.s32.totalorder %s2400_s3, %s1942_s10  ;;  %p1946_p6 = scmp.lt.u32.totalorder %s1942_s10, %s2400_s3 }
 0x163   :  { %p1948_p7 = pnand %p1946_p6, %p1943_p5 }
 0x165   :  { %1951 = shalt.err (!%p1948_p7)
}
 0x166   :  { %1486 = dma.vmem_to_hbm [thread:$0]  %s1484_s2, 32, %s2400_s3, [#allocation3]  }
 0x167   :  { %1952 = dma.done.wait [#allocation3], 32  }
 0x168   :  { %1953 = vsyncadd [#allocation3], 4294967264 }
 0x169   :  { %1490 = vsyncpa [#allocation3], 1 }

</bundles_post_ra>
